<compile_context>
chip_gen: v6e
topology: v6e:2x2x1
jax: 0.10.0
libtpu: 0.0.40
codegen_flags: <defaults>
</compile_context>

<pallas_src>
import math

import jax
import jax.numpy as jnp
from jax.experimental import pallas as pl
from jax.experimental.pallas import tpu as pltpu

BATCH = 32         # matches `batch_size` in ddpg.py (len(x) > 2 branch)
D_IN = 360
D_IN_PAD = 384     # 3 x 128 lanes (fc1 K dim, zero-padded)
H1 = 128
H2 = 128
H3 = 64
H3_PAD = 128       # zero-padded so fc3 N / fc_mu K are full lane tiles
D_OUT = 2
D_OUT_PAD = 128    # lane-dense output tile; real columns are [:, :2]


def _round_up(n, m):
    return ((n + m - 1) // m) * m


def munet_kernel(x_ref, w1_ref, b1_ref, w2_ref, b2_ref,
                 w3_ref, b3_ref, w4_ref, b4_ref, out_ref):
    # fc1 + relu (dropout = identity at inference). bf16 MXU, f32 accumulate.
    h = jnp.dot(x_ref[...], w1_ref[...], preferred_element_type=jnp.float32)
    h = jnp.maximum(h + b1_ref[...], 0.0)
    # fc2 + relu
    h = jnp.dot(h.astype(jnp.bfloat16), w2_ref[...],
                preferred_element_type=jnp.float32)
    h = jnp.maximum(h + b2_ref[...], 0.0)
    # fc3 + relu (N padded 64 -> 128 with zero columns)
    h = jnp.dot(h.astype(jnp.bfloat16), w3_ref[...],
                preferred_element_type=jnp.float32)
    h = jnp.maximum(h + b3_ref[...], 0.0)
    # fc_mu (K padded with zero rows, N padded 2 -> 128 with zero columns)
    z = jnp.dot(h.astype(jnp.bfloat16), w4_ref[...],
                preferred_element_type=jnp.float32)
    z = z + b4_ref[...]
    # head: col 0 -> relu, col 1 -> tanh*3. One VPU select + one EUP tanh on
    # the resident z tile; padded columns stay 0 either way.
    col = jax.lax.broadcasted_iota(jnp.int32, z.shape, 1)
    out_ref[...] = jnp.where(col == 0, jnp.maximum(z, 0.0), jnp.tanh(z) * 3.0)


def munet_forward(x, params, *, block_m=256):
    w1, b1, w2, b2, w3, b3, w4, b4 = params
    B = x.shape[0]
    # Per-grid-step batch tile: up to 256 rows (fills MXU M on v6e/v7x); small
    # batches collapse to a single tile rounded to the sublane multiple.
    tm = min(block_m, _round_up(B, 8))
    B_pad = _round_up(B, tm)

    # Pad batch + feature dims and cast activations to bf16 once, host-side of
    # the kernel (halves x HBM traffic; kernel consumes bf16 directly).
    x_pad = jnp.pad(x.astype(jnp.float32),
                    ((0, B_pad - B), (0, D_IN_PAD - D_IN))).astype(jnp.bfloat16)

    def const_spec(shape):
        # Constant index_map -> fetched once, VMEM-resident across grid steps.
        return pl.BlockSpec(shape, lambda i: tuple(0 for _ in shape))

    out = pl.pallas_call(
        munet_kernel,
        out_shape=jax.ShapeDtypeStruct((B_pad, D_OUT_PAD), jnp.float32),
        grid=(B_pad // tm,),
        in_specs=[
            pl.BlockSpec((tm, D_IN_PAD), lambda i: (i, 0)),   # x: per-tile
            const_spec(w1.shape), const_spec(b1.shape),
            const_spec(w2.shape), const_spec(b2.shape),
            const_spec(w3.shape), const_spec(b3.shape),
            const_spec(w4.shape), const_spec(b4.shape),
        ],
        out_specs=pl.BlockSpec((tm, D_OUT_PAD), lambda i: (i, 0)),
        compiler_params=pltpu.CompilerParams(
            dimension_semantics=("parallel",),   # v7x: split batch tiles over TCs
            vmem_limit_bytes=4 * 1024 * 1024),   # footprint < 1 MiB; keep modest
    )(x_pad, w1, b1, w2, b2, w3, b3, w4, b4)

    return out[:B, :D_OUT]


def init_params(key):
    """PyTorch nn.Linear-style init (uniform +/- 1/sqrt(fan_in)).
    Weights stored (in, out), zero-padded to lane-aligned shapes, bf16 for the
    MXU; biases stay f32 (1, out) for the f32 elementwise path."""
    def linear(key, fan_in, fan_out, pad_in, pad_out):
        kw, kb = jax.random.split(key)
        bound = 1.0 / math.sqrt(float(fan_in))
        w = jax.random.uniform(kw, (fan_in, fan_out), jnp.float32, -bound, bound)
        b = jax.random.uniform(kb, (fan_out,), jnp.float32, -bound, bound)
        w = jnp.pad(w, ((0, pad_in - fan_in), (0, pad_out - fan_out)))
        b = jnp.pad(b, (0, pad_out - fan_out)).reshape(1, pad_out)
        return w.astype(jnp.bfloat16), b

    k1, k2, k3, k4 = jax.random.split(key, 4)
    w1, b1 = linear(k1, D_IN, H1, D_IN_PAD, H1)
    w2, b2 = linear(k2, H1, H2, H1, H2)
    w3, b3 = linear(k3, H2, H3, H2, H3_PAD)
    w4, b4 = linear(k4, H3, D_OUT, H3_PAD, D_OUT_PAD)
    return (w1, b1, w2, b2, w3, b3, w4, b4)


def munet_reference(x, params):
    """Pure-JAX reference mirroring the kernel math (bf16 dots, f32 elementwise)."""
    w1, b1, w2, b2, w3, b3, w4, b4 = params
    xp = jnp.pad(x.astype(jnp.float32),
                 ((0, 0), (0, D_IN_PAD - D_IN))).astype(jnp.bfloat16)
    h = jnp.maximum(jnp.dot(xp, w1, preferred_element_type=jnp.float32) + b1, 0.0)
    h = jnp.maximum(jnp.dot(h.astype(jnp.bfloat16), w2,
                            preferred_element_type=jnp.float32) + b2, 0.0)
    h = jnp.maximum(jnp.dot(h.astype(jnp.bfloat16), w3,
                            preferred_element_type=jnp.float32) + b3, 0.0)
    z = jnp.dot(h.astype(jnp.bfloat16), w4,
                preferred_element_type=jnp.float32) + b4
    return jnp.concatenate(
        [jnp.maximum(z[:, 0:1], 0.0), jnp.tanh(z[:, 1:2]) * 3.0], axis=-1)


if __name__ == "__main__":
    key = jax.random.PRNGKey(0)
    kx, kp = jax.random.split(key)
    x = jax.random.normal(kx, (BATCH, D_IN), dtype=jnp.float32)
    params = init_params(kp)

    out = jax.block_until_ready(munet_forward(x, params))
    ref = jax.block_until_ready(munet_reference(x, params))

    assert out.shape == (BATCH, D_OUT), out.shape
    assert jnp.allclose(out, ref, atol=2e-2, rtol=2e-2), \
        float(jnp.max(jnp.abs(out - ref)))

    print("KERNEL_OK")
</pallas_src>

<mosaic_0001>
module attributes {stable_mosaic.version = 11 : i64} {
  func.func @munet_kernel(%arg0: i32, %arg1: memref<32x384xbf16, #tpu.memory_space<vmem>>, %arg2: memref<384x128xbf16, #tpu.memory_space<vmem>>, %arg3: memref<1x128xf32, #tpu.memory_space<vmem>>, %arg4: memref<128x128xbf16, #tpu.memory_space<vmem>>, %arg5: memref<1x128xf32, #tpu.memory_space<vmem>>, %arg6: memref<128x128xbf16, #tpu.memory_space<vmem>>, %arg7: memref<1x128xf32, #tpu.memory_space<vmem>>, %arg8: memref<128x128xbf16, #tpu.memory_space<vmem>>, %arg9: memref<1x128xf32, #tpu.memory_space<vmem>>, %arg10: memref<32x128xf32, #tpu.memory_space<vmem>>) attributes {dimension_semantics = [#tpu.dimension_semantics<parallel>], iteration_bounds = array<i64: 1>, scalar_prefetch = 0 : i64, scratch_operands = 0 : i64, tpu.core_type = #tpu.core_type<tc>, window_params = [{transform_indices = @transform_0, window_bounds = array<i64: 32, 384>}, {pipeline_mode = #tpu.pipeline_mode<synchronous>, transform_indices = @transform_1, window_bounds = array<i64: 384, 128>}, {pipeline_mode = #tpu.pipeline_mode<synchronous>, transform_indices = @transform_2, window_bounds = array<i64: 1, 128>}, {pipeline_mode = #tpu.pipeline_mode<synchronous>, transform_indices = @transform_3, window_bounds = array<i64: 128, 128>}, {pipeline_mode = #tpu.pipeline_mode<synchronous>, transform_indices = @transform_4, window_bounds = array<i64: 1, 128>}, {pipeline_mode = #tpu.pipeline_mode<synchronous>, transform_indices = @transform_5, window_bounds = array<i64: 128, 128>}, {pipeline_mode = #tpu.pipeline_mode<synchronous>, transform_indices = @transform_6, window_bounds = array<i64: 1, 128>}, {pipeline_mode = #tpu.pipeline_mode<synchronous>, transform_indices = @transform_7, window_bounds = array<i64: 128, 128>}, {pipeline_mode = #tpu.pipeline_mode<synchronous>, transform_indices = @transform_8, window_bounds = array<i64: 1, 128>}, {transform_indices = @transform_9, window_bounds = array<i64: 32, 128>}]} {
    %c0 = arith.constant 0 : index
    %c0_0 = arith.constant 0 : index
    %0 = vector.load %arg1[%c0, %c0_0] : memref<32x384xbf16, #tpu.memory_space<vmem>>, vector<32x384xbf16>
    %c0_1 = arith.constant 0 : index
    %c0_2 = arith.constant 0 : index
    %1 = vector.load %arg2[%c0_1, %c0_2] : memref<384x128xbf16, #tpu.memory_space<vmem>>, vector<384x128xbf16>
    %cst = arith.constant dense<0.000000e+00> : vector<32x128xf32>
    %2 = tpu.matmul %0, %1, %cst {dimension_numbers = #tpu.dot_dimension_numbers<[1], [0], [0], [1], [0, 0, 1, 1], [], []>} : vector<32x384xbf16>, vector<384x128xbf16>, vector<32x128xf32> -> vector<32x128xf32>
    %c0_3 = arith.constant 0 : index
    %c0_4 = arith.constant 0 : index
    %3 = vector.load %arg3[%c0_3, %c0_4] : memref<1x128xf32, #tpu.memory_space<vmem>>, vector<1x128xf32>
    %4 = vector.broadcast %3 : vector<1x128xf32> to vector<32x128xf32>
    %5 = arith.addf %2, %4 : vector<32x128xf32>
    %cst_5 = arith.constant 0.000000e+00 : f32
    %6 = vector.broadcast %cst_5 : f32 to vector<32x128xf32>
    %7 = arith.maximumf %5, %6 : vector<32x128xf32>
    %8 = arith.truncf %7 : vector<32x128xf32> to vector<32x128xbf16>
    %c0_6 = arith.constant 0 : index
    %c0_7 = arith.constant 0 : index
    %9 = vector.load %arg4[%c0_6, %c0_7] : memref<128x128xbf16, #tpu.memory_space<vmem>>, vector<128x128xbf16>
    %cst_8 = arith.constant dense<0.000000e+00> : vector<32x128xf32>
    %10 = tpu.matmul %8, %9, %cst_8 {dimension_numbers = #tpu.dot_dimension_numbers<[1], [0], [0], [1], [0, 0, 1, 1], [], []>} : vector<32x128xbf16>, vector<128x128xbf16>, vector<32x128xf32> -> vector<32x128xf32>
    %c0_9 = arith.constant 0 : index
    %c0_10 = arith.constant 0 : index
    %11 = vector.load %arg5[%c0_9, %c0_10] : memref<1x128xf32, #tpu.memory_space<vmem>>, vector<1x128xf32>
    %12 = vector.broadcast %11 : vector<1x128xf32> to vector<32x128xf32>
    %13 = arith.addf %10, %12 : vector<32x128xf32>
    %cst_11 = arith.constant 0.000000e+00 : f32
    %14 = vector.broadcast %cst_11 : f32 to vector<32x128xf32>
    %15 = arith.maximumf %13, %14 : vector<32x128xf32>
    %16 = arith.truncf %15 : vector<32x128xf32> to vector<32x128xbf16>
    %c0_12 = arith.constant 0 : index
    %c0_13 = arith.constant 0 : index
    %17 = vector.load %arg6[%c0_12, %c0_13] : memref<128x128xbf16, #tpu.memory_space<vmem>>, vector<128x128xbf16>
    %cst_14 = arith.constant dense<0.000000e+00> : vector<32x128xf32>
    %18 = tpu.matmul %16, %17, %cst_14 {dimension_numbers = #tpu.dot_dimension_numbers<[1], [0], [0], [1], [0, 0, 1, 1], [], []>} : vector<32x128xbf16>, vector<128x128xbf16>, vector<32x128xf32> -> vector<32x128xf32>
    %c0_15 = arith.constant 0 : index
    %c0_16 = arith.constant 0 : index
    %19 = vector.load %arg7[%c0_15, %c0_16] : memref<1x128xf32, #tpu.memory_space<vmem>>, vector<1x128xf32>
    %20 = vector.broadcast %19 : vector<1x128xf32> to vector<32x128xf32>
    %21 = arith.addf %18, %20 : vector<32x128xf32>
    %cst_17 = arith.constant 0.000000e+00 : f32
    %22 = vector.broadcast %cst_17 : f32 to vector<32x128xf32>
    %23 = arith.maximumf %21, %22 : vector<32x128xf32>
    %24 = arith.truncf %23 : vector<32x128xf32> to vector<32x128xbf16>
    %c0_18 = arith.constant 0 : index
    %c0_19 = arith.constant 0 : index
    %25 = vector.load %arg8[%c0_18, %c0_19] : memref<128x128xbf16, #tpu.memory_space<vmem>>, vector<128x128xbf16>
    %cst_20 = arith.constant dense<0.000000e+00> : vector<32x128xf32>
    %26 = tpu.matmul %24, %25, %cst_20 {dimension_numbers = #tpu.dot_dimension_numbers<[1], [0], [0], [1], [0, 0, 1, 1], [], []>} : vector<32x128xbf16>, vector<128x128xbf16>, vector<32x128xf32> -> vector<32x128xf32>
    %c0_21 = arith.constant 0 : index
    %c0_22 = arith.constant 0 : index
    %27 = vector.load %arg9[%c0_21, %c0_22] : memref<1x128xf32, #tpu.memory_space<vmem>>, vector<1x128xf32>
    %28 = vector.broadcast %27 : vector<1x128xf32> to vector<32x128xf32>
    %29 = arith.addf %26, %28 : vector<32x128xf32>
    %30 = tpu.iota {dimensions = array<i32: 1>} : vector<32x128xi32>
    %c0_i32 = arith.constant 0 : i32
    %31 = vector.broadcast %c0_i32 : i32 to vector<32x128xi32>
    %32 = arith.cmpi eq, %30, %31 : vector<32x128xi32>
    %cst_23 = arith.constant 0.000000e+00 : f32
    %33 = vector.broadcast %cst_23 : f32 to vector<32x128xf32>
    %34 = arith.maximumf %29, %33 : vector<32x128xf32>
    %35 = math.tanh %29 : vector<32x128xf32>
    %cst_24 = arith.constant 3.000000e+00 : f32
    %36 = vector.broadcast %cst_24 : f32 to vector<32x128xf32>
    %37 = arith.mulf %35, %36 : vector<32x128xf32>
    %38 = arith.select %32, %34, %37 : vector<32x128xi1>, vector<32x128xf32>
    %c0_25 = arith.constant 0 : index
    %c0_26 = arith.constant 0 : index
    %39 = vector.load %arg10[%c0_25, %c0_26] : memref<32x128xf32, #tpu.memory_space<vmem>>, vector<32x128xf32>
    tpu.vector_store %arg10[%c0_25, %c0_26], %38 {strides = array<i32>} : memref<32x128xf32, #tpu.memory_space<vmem>>, vector<32x128xf32>,
    return
  }
  func.func @transform_0(%arg0: i32) -> (i32, i32) {
    %c0_i32 = arith.constant 0 : i32
    %c0_i32_0 = arith.constant 0 : i32
    return %arg0, %c0_i32 : i32, i32
  }
  func.func @transform_1(%arg0: i32) -> (i32, i32) {
    %c0_i32 = arith.constant 0 : i32
    %c0_i32_0 = arith.constant 0 : i32
    %c0_i32_1 = arith.constant 0 : i32
    return %c0_i32, %c0_i32_0 : i32, i32
  }
  func.func @transform_2(%arg0: i32) -> (i32, i32) {
    %c0_i32 = arith.constant 0 : i32
    %c0_i32_0 = arith.constant 0 : i32
    %c0_i32_1 = arith.constant 0 : i32
    return %c0_i32, %c0_i32_0 : i32, i32
  }
  func.func @transform_3(%arg0: i32) -> (i32, i32) {
    %c0_i32 = arith.constant 0 : i32
    %c0_i32_0 = arith.constant 0 : i32
    %c0_i32_1 = arith.constant 0 : i32
    return %c0_i32, %c0_i32_0 : i32, i32
  }
  func.func @transform_4(%arg0: i32) -> (i32, i32) {
    %c0_i32 = arith.constant 0 : i32
    %c0_i32_0 = arith.constant 0 : i32
    %c0_i32_1 = arith.constant 0 : i32
    return %c0_i32, %c0_i32_0 : i32, i32
  }
  func.func @transform_5(%arg0: i32) -> (i32, i32) {
    %c0_i32 = arith.constant 0 : i32
    %c0_i32_0 = arith.constant 0 : i32
    %c0_i32_1 = arith.constant 0 : i32
    return %c0_i32, %c0_i32_0 : i32, i32
  }
  func.func @transform_6(%arg0: i32) -> (i32, i32) {
    %c0_i32 = arith.constant 0 : i32
    %c0_i32_0 = arith.constant 0 : i32
    %c0_i32_1 = arith.constant 0 : i32
    return %c0_i32, %c0_i32_0 : i32, i32
  }
  func.func @transform_7(%arg0: i32) -> (i32, i32) {
    %c0_i32 = arith.constant 0 : i32
    %c0_i32_0 = arith.constant 0 : i32
    %c0_i32_1 = arith.constant 0 : i32
    return %c0_i32, %c0_i32_0 : i32, i32
  }
  func.func @transform_8(%arg0: i32) -> (i32, i32) {
    %c0_i32 = arith.constant 0 : i32
    %c0_i32_0 = arith.constant 0 : i32
    %c0_i32_1 = arith.constant 0 : i32
    return %c0_i32, %c0_i32_0 : i32, i32
  }
  func.func @transform_9(%arg0: i32) -> (i32, i32) {
    %c0_i32 = arith.constant 0 : i32
    %c0_i32_0 = arith.constant 0 : i32
    return %arg0, %c0_i32 : i32, i32
  }
}

</mosaic_0001>

<bundles_post_ra>
// kernel: tpu_custom_call.1
= control target key start
LH: loop header
LB: loop body
LE: loop exit
PB: predicated region body
PF: predicated region fallthrough
CT: control target
= control target key end

     0   :  { %14 = vsyncpa [#allocation3], 0  ;;  %s1377_s0 = inlined_call_operand.hbm [shape: bf16[32,384], index: 0, kind: input, shape index: {}]   ;;  %s1378_s1 = inlined_call_operand.hbm [shape: bf16[384,128], index: 1, kind: input, shape index: {}]   ;;  %s1379_s2 = inlined_call_operand.vmem [shape: f32[1,128], index: 2, kind: input, shape index: {}]   ;;  %s1380_s3 = inlined_call_operand.hbm [shape: bf16[128,128], index: 3, kind: input, shape index: {}]   ;;  %s1381_s4 = inlined_call_operand.vmem [shape: f32[1,128], index: 4, kind: input, shape index: {}]   ;;  %s1382_s5 = inlined_call_operand.hbm [shape: bf16[128,128], index: 5, kind: input, shape index: {}]   ;;  %s1383_s6 = inlined_call_operand.vmem [shape: f32[1,128], index: 6, kind: input, shape index: {}]   ;;  %s1384_s7 = inlined_call_operand.hbm [shape: bf16[128,128], index: 7, kind: input, shape index: {}]   ;;  %s1385_s8 = inlined_call_operand.vmem [shape: f32[1,128], index: 8, kind: input, shape index: {}]   ;;  %s1386_s9 = inlined_call_operand.hbm [shape: f32[32,128], index: 9, kind: output, shape index: {}]  }
   0x1   :  { %15 = vsyncpa [#allocation6], 0 }
   0x2   :  { %16 = vsyncpa [#allocation9], 0 }
   0x3   :  { %17 = vsyncpa [#allocation4], 0  ;;  %s1269_s30 = smov [#allocation5]  }
   0x4   :  { %s35_s10 = sshll.u32 %s1269_s30, 4  ;;  %s36_s10 = int_to_ptr.vmem [resolvable:$true] %s35_s10 }
   0x5   :  { %s1149_s11 = scalar_lea.vmem %s36_s10, 3072  ;;  %p1154_p1 = scmp.lt.s32.totalorder %s36_s10, %s36_s10 }
   0x6   :  { %p1150_p0 = scmp.ne.s32.totalorder %s36_s10, %s1149_s11  ;;  %p1155_p2 = scmp.lt.s32.totalorder %s1149_s11, %s1149_s11 }
   0x8   :  { %p1156_p3 = por %p1155_p2, %p1154_p1 }
   0xa   :  { %p1157_p4 = pnand %p1156_p3, %p1150_p0 }
   0xc   :  { %1160 = shalt.err (!%p1157_p4)
}
   0xd   :  { %s1270_s12 = smov 64   ;;  %s1271_s13 = smov 4  }
   0xe   :  { %41 = dma.hbm_to_vmem [thread:$0]  %s1378_s1, 3072, %s36_s10, [#allocation6], %s1270_s12, %s1270_s12, %s1271_s13  }
   0xf   :  { %s1272_s16 = smov [#allocation8]   ;;  %s1273_s18 = smov [#allocation2]  }
  0x10   :  { %s63_s17 = sshll.u32 %s1272_s16, 4  ;;  %s23_s19 = sshll.u32 %s1273_s18, 4  ;;  %s64_s17 = int_to_ptr.vmem [resolvable:$true] %s63_s17  ;;  %s24_s19 = int_to_ptr.vmem [resolvable:$true] %s23_s19 }
  0x11   :  { %s1169_s20 = scalar_lea.vmem %s64_s17, 1024  ;;  %p1174_p6 = scmp.lt.s32.totalorder %s64_s17, %s64_s17 }
  0x12   :  { %p1170_p5 = scmp.ne.s32.totalorder %s64_s17, %s1169_s20  ;;  %p1175_p7 = scmp.lt.s32.totalorder %s1169_s20, %s1169_s20 }
  0x14   :  { %p1176_p8 = por %p1175_p7, %p1174_p6 }
  0x16   :  { %p1177_p9 = pnand %p1176_p8, %p1170_p5 }
  0x18   :  { %1180 = shalt.err (!%p1177_p9)
}
  0x19   :  { %69 = dma.hbm_to_vmem [thread:$0]  %s1382_s5, 1024, %s64_s17, [#allocation9], %s1270_s12, %s1270_s12, %s1271_s13  }
  0x1a   :  { %s1189_s1 = scalar_lea.vmem %s24_s19, 768  ;;  %p1194_p11 = scmp.lt.s32.totalorder %s24_s19, %s24_s19 }
  0x1b   :  { %p1190_p10 = scmp.ne.s32.totalorder %s24_s19, %s1189_s1  ;;  %p1195_p12 = scmp.lt.s32.totalorder %s1189_s1, %s1189_s1 }
  0x1d   :  { %p1196_p13 = por %p1195_p12, %p1194_p11 }
  0x1f   :  { %p1197_p0 = pnand %p1196_p13, %p1190_p10 }
  0x21   :  { %1200 = shalt.err (!%p1197_p0)
}
  0x22   :  { %s1274_s23 = smov 192   ;;  %s1275_s24 = smov 12  }
  0x23   :  { %29 = dma.hbm_to_vmem [thread:$0]  %s1377_s0, 768, %s24_s19, [#allocation3], %s1274_s23, %s1274_s23, %s1275_s24  }
  0x24   :  { %s1276_s27 = smov [#allocation7]   ;;  %s1277_s29 = smov [#allocation10]  }
  0x25   :  { %s49_s28 = sshll.u32 %s1276_s27, 4  ;;  %s77_s30 = sshll.u32 %s1277_s29, 4  ;;  %s50_s28 = int_to_ptr.vmem [resolvable:$true] %s49_s28  ;;  %s78_s30 = int_to_ptr.vmem [resolvable:$true] %s77_s30 }
  0x26   :  { %s1209_s5 = scalar_lea.vmem %s50_s28, 1024  ;;  %p1214_p2 = scmp.lt.s32.totalorder %s50_s28, %s50_s28 }
  0x27   :  { %p1210_p1 = scmp.ne.s32.totalorder %s50_s28, %s1209_s5  ;;  %p1215_p3 = scmp.lt.s32.totalorder %s1209_s5, %s1209_s5 }
  0x29   :  { %p1216_p4 = por %p1215_p3, %p1214_p2 }
  0x2b   :  { %p1217_p5 = pnand %p1216_p4, %p1210_p1 }
  0x2d   :  { %1220 = shalt.err (!%p1217_p5)
}
  0x2e   :  { %55 = dma.hbm_to_vmem [thread:$0]  %s1380_s3, 1024, %s50_s28, [#allocation6], %s1270_s12, %s1270_s12, %s1271_s13  }
  0x2f   :  { %s1229_s0 = scalar_lea.vmem %s78_s30, 1024  ;;  %p1234_p7 = scmp.lt.s32.totalorder %s78_s30, %s78_s30 }
  0x30   :  { %p1230_p6 = scmp.ne.s32.totalorder %s78_s30, %s1229_s0  ;;  %p1235_p8 = scmp.lt.s32.totalorder %s1229_s0, %s1229_s0 }
  0x32   :  { %p1236_p9 = por %p1235_p8, %p1234_p7 }
  0x34   :  { %p1237_p10 = pnand %p1236_p9, %p1230_p6 }
  0x36   :  { %1240 = shalt.err (!%p1237_p10)
}
  0x37   :  { %83 = dma.hbm_to_vmem [thread:$0]  %s1384_s7, 1024, %s78_s30, [#allocation9], %s1270_s12, %s1270_s12, %s1271_s13  }
  0x38   :  { %1261 = dma.done.wait [#allocation3], 768  }
  0x39   :  { %1262 = vsyncadd [#allocation3], 4294966528 }
  0x3a   :  { %1263 = dma.done.wait [#allocation6], 4096  }
  0x3b   :  { %1264 = vsyncadd [#allocation6], 4294963200 }
  0x3c   :  { %1265 = dma.done.wait [#allocation9], 2048  }
  0x3d   :  { %1266 = vsyncadd [#allocation9], 4294965248  ;;  %v1077_v0 = vld [vmem:[#allocation5 + $0x78] sm:$0xff]   ;;  %v1079_v2 = vld [vmem:[#allocation5 + $0x70] sm:$0xff]  }
  0x3e   :  { %v1078_v1 = vld [vmem:[#allocation5 + $0x38] sm:$0xff]   ;;  %917 = vmatprep.subr.bf16.mxu0 %v1077_v0  ;;  %v1081_v4 = vld [vmem:[#allocation5 + $0x30] sm:$0xff]   ;;  %v1082_v5 = vld [vmem:[#allocation5 + $0x68] sm:$0xff]  }
  0x3f   :  { %918 = vmatpush3.bf16.msra.mxu0 %v1078_v1  ;;  %v1080_v3 = vld [vmem:[#allocation5 + $0xb8] sm:$0xff]   ;;  %v1083_v6 = vld [vmem:[#allocation5 + $0xb0] sm:$0xff]   ;;  %v1084_v7 = vld [vmem:[#allocation5 + $0x28] sm:$0xff]  }
  0x40   :  { %919 = vmatprep.subr.bf16.mxu0 %v1079_v2  ;;  %985 = vmatprep.subr.bf16.mxu1 %v1080_v3  ;;  %v1085_v8 = vld [vmem:[#allocation5 + $0x60] sm:$0xff]   ;;  %v1086_v9 = vld [vmem:[#allocation5 + $0xa8] sm:$0xff]   ;;  %v1088_v11 = vld [vmem:[#allocation5 + $0x58] sm:$0xff]  }
  0x41   :  { %986 = vmatpush3.bf16.msra.mxu1 %v1080_v3  ;;  %v1087_v10 = vld [vmem:[#allocation5 + $0x20] sm:$0xff]   ;;  %v1090_v13 = vld [vmem:[#allocation5 + $0x18] sm:$0xff]   ;;  %v1091_v15 = vld [vmem:[#allocation5 + $0x50] sm:$0xff]  }
  0x42   :  { %987 = vmatprep.subr.bf16.mxu1 %v1083_v6  ;;  %v1089_v12 = vld [vmem:[#allocation5 + $0xa0] sm:$0xff]   ;;  %v1092_v14 = vld [vmem:[#allocation5 + $0x98] sm:$0xff]   ;;  %v1093_v16 = vld [vmem:[#allocation5 + $0x10] sm:$0xff]  }
  0x43   :  { %920 = vmatpush3.bf16.msra.mxu0 %v1081_v4  ;;  %v1095_v17 = vld [vmem:[#allocation5 + $0x90] sm:$0xff]   ;;  %v1094_v18 = vld [vmem:[#allocation5 + $0x48] sm:$0xff]   ;;  %v1097_v20 = vld [vmem:[#allocation5 + $0x40] sm:$0xff]  }
  0x44   :  { %921 = vmatprep.subr.bf16.mxu0 %v1082_v5  ;;  %v1096_v19 = vld [vmem:[#allocation5 + $0x8] sm:$0xff]   ;;  %v1102_v22 = vld [vmem:[#allocation2 + $0x4] ss:$12 sps:$4 sm:$0xff]   ;;  %v1104_v24 = vld [vmem:[#allocation2 + $0x8] ss:$12 sps:$4 sm:$0xff]  }
  0x45   :  { %988 = vmatpush3.bf16.msra.mxu1 %v1083_v6  ;;  %v1098_v21 = vld [vmem:[#allocation5 + $0x88] sm:$0xff]   ;;  %v1099_v23 = vld [vmem:[#allocation5] sm:$0xff]   ;;  %373 = vmatprep.mubr.bf16.mxu0 %v1102_v22  ;;  %v1100_v26 = vld [vmem:[#allocation2] ss:$12 sps:$4 sm:$0xff]  }
  0x46   :  { %989 = vmatprep.subr.bf16.mxu1 %v1086_v9  ;;  %v1103_v25 = vld [vmem:[#allocation5 + $0x80] sm:$0xff]   ;;  %1001 = vmatprep.mubr.bf16.mxu1 %v1104_v24  ;;  %v1106_v27 = vld [vmem:[#allocation2 + $0x1c] ss:$12 sps:$4 sm:$0xff]   ;;  %v1110_v29 = vld [vmem:[#allocation7 + $0x30] sm:$0xff]  }
  0x47   :  { %922 = vmatpush3.bf16.msra.mxu0 %v1084_v7  ;;  %v1109_v28 = vld [vmem:[#allocation7 + $0x38] sm:$0xff]   ;;  %v1108_v31 = vld [vmem:[#allocation2 + $0x18] ss:$12 sps:$4 sm:$0xff]   ;;  %v1112_v33 = vld [vmem:[#allocation7 + $0x20] sm:$0xff]  }
  0x48   :  { %923 = vmatprep.subr.bf16.mxu0 %v1085_v8  ;;  %v1105_v30 = vld [vmem:[#allocation2 + $0x20] ss:$12 sps:$4 sm:$0xff]   ;;  %v1111_v32 = vld [vmem:[#allocation7 + $0x28] sm:$0xff]   ;;  %v1116_v37 = vld [vmem:[#allocation7] sm:$0xff]  }
  0x49   :  { %990 = vmatpush3.bf16.msra.mxu1 %v1086_v9  ;;  %v1113_v34 = vld [vmem:[#allocation7 + $0x18] sm:$0xff]   ;;  %v1114_v35 = vld [vmem:[#allocation7 + $0x10] sm:$0xff]   ;;  %v1115_v36 = vld [vmem:[#allocation7 + $0x8] sm:$0xff]  }
  0x4a   :  { %991 = vmatprep.subr.bf16.mxu1 %v1089_v12  ;;  %v1117_v38 = vld [vmem:[#allocation8 + $0x38] sm:$0xff]   ;;  %v1118_v39 = vld [vmem:[#allocation8 + $0x30] sm:$0xff]   ;;  %v1119_v40 = vld [vmem:[#allocation8 + $0x28] sm:$0xff]  }
  0x4b   :  { %924 = vmatpush3.bf16.msra.mxu0 %v1087_v10  ;;  %v1120_v41 = vld [vmem:[#allocation8 + $0x20] sm:$0xff]   ;;  %v1121_v42 = vld [vmem:[#allocation8 + $0x18] sm:$0xff]   ;;  %v859_v45 = vld [vmem:[%s1379_s2] ss:$0 sm:$0xff] }
  0x4c   :  { %925 = vmatprep.subr.bf16.mxu0 %v1088_v11  ;;  %v1122_v10 = vld [vmem:[#allocation8 + $0x10] sm:$0xff]   ;;  %v1123_v11 = vld [vmem:[#allocation8 + $0x8] sm:$0xff]  }
  0x4d   :  { %992 = vmatpush3.bf16.msra.mxu1 %v1089_v12  ;;  %v1124_v12 = vld [vmem:[#allocation8] sm:$0xff]  }
  0x4e   :  { %993 = vmatprep.subr.bf16.mxu1 %v1092_v14 }
  0x4f   :  { %926 = vmatpush3.bf16.msra.mxu0 %v1090_v13  ;;  %v1125_v13 = vld [vmem:[#allocation10 + $0x38] sm:$0xff]  }
  0x50   :  { %927 = vmatprep.subr.bf16.mxu0 %v1091_v15  ;;  %v1127_v15 = vld [vmem:[#allocation10 + $0x28] sm:$0xff]  }
  0x51   :  { %994 = vmatpush3.bf16.msra.mxu1 %v1092_v14  ;;  %v1126_v14 = vld [vmem:[#allocation10 + $0x30] sm:$0xff]  }
  0x52   :  { %995 = vmatprep.subr.bf16.mxu1 %v1095_v17 }
  0x53   :  { %928 = vmatpush3.bf16.msra.mxu0 %v1093_v16  ;;  %v1128_v16 = vld [vmem:[#allocation10 + $0x20] sm:$0xff]  }
  0x54   :  { %929 = vmatprep.subr.bf16.mxu0 %v1094_v18 }
  0x55   :  { %996 = vmatpush3.bf16.msra.mxu1 %v1095_v17  ;;  %v1129_v17 = vld [vmem:[#allocation10 + $0x18] sm:$0xff]  }
  0x56   :  { %997 = vmatprep.subr.bf16.mxu1 %v1098_v21 }
  0x57   :  { %930 = vmatpush3.bf16.msra.mxu0 %v1096_v19 }
  0x58   :  { %931 = vmatprep.subr.bf16.mxu0 %v1097_v20  ;;  %v890_v20 = vld [vmem:[%s1381_s4] ss:$0 sm:$0xff] }
  0x59   :  { %998 = vmatpush3.bf16.msra.mxu1 %v1098_v21 }
  0x5a   :  { %999 = vmatprep.subr.bf16.mxu1 %v1103_v25 }
  0x5b   :  { %932 = vmatpush3.bf16.msra.mxu0 %v1099_v23 }
  0x5c   :  { %1005 = vmatprep.subr.bf16.mxu0 %v1109_v28 }
  0x5d   :  { %1000 = vmatpush3.bf16.msra.mxu1 %v1103_v25 }
  0x5e   :  { %374 = vmatmul.mubr.bf16.vlgmr.msra.gmra.mxu0 %v1100_v26  ;;  %1025 = vmatprep.subr.bf16.mxu1 %v1117_v38 }
  0x5f   :  { %381 = vmatprep.mubr.bf16.mxu0 %v1106_v27  ;;  %1006 = vmatpush3.bf16.msra.mxu0 %v1109_v28 }
  0x60   :  { %1007 = vmatprep.subr.bf16.mxu0 %v1110_v29  ;;  %1002 = vmatmul.mubr.bf16.vlgmr.msra.gmra.mxu1 %v1105_v30 }
  0x61   :  { %1026 = vmatpush3.bf16.msra.mxu1 %v1117_v38  ;;  %v899_v38 = vld [vmem:[%s1383_s6] ss:$0 sm:$0xff]  ;;  %s1278_s6 = smov [#allocation11]  }
  0x62   :  { %1027 = vmatprep.subr.bf16.mxu1 %v1118_v39 }
  0x63   :  { %1008 = vmatpush3.bf16.msra.mxu0 %v1110_v29 }
  0x64   :  { %1009 = vmatprep.subr.bf16.mxu0 %v1111_v32 }
  0x65   :  { %1028 = vmatpush3.bf16.msra.mxu1 %v1118_v39 }
  0x66   :  { %382 = vmatmul.mubr.bf16.gmra.mxu0 %v1108_v31  ;;  %1029 = vmatprep.subr.bf16.mxu1 %v1119_v40 }
  0x67   :  { %1010 = vmatpush3.bf16.msra.mxu0 %v1111_v32 }
  0x68   :  { %1011 = vmatprep.subr.bf16.mxu0 %v1112_v33 }
  0x69   :  { %1030 = vmatpush3.bf16.msra.mxu1 %v1119_v40 }
  0x6a   :  { %1031 = vmatprep.subr.bf16.mxu1 %v1120_v41 }
  0x6b   :  { %1012 = vmatpush3.bf16.msra.mxu0 %v1112_v33  ;;  %v1130_v33 = vld [vmem:[#allocation10 + $0x10] sm:$0xff]  }
  0x6c   :  { %1013 = vmatprep.subr.bf16.mxu0 %v1113_v34 }
  0x6d   :  { %1032 = vmatpush3.bf16.msra.mxu1 %v1120_v41 }
  0x6e   :  { %1033 = vmatprep.subr.bf16.mxu1 %v1121_v42 }
  0x6f   :  { %1014 = vmatpush3.bf16.msra.mxu0 %v1113_v34  ;;  %v1131_v34 = vld [vmem:[#allocation10 + $0x8] sm:$0xff]  }
  0x70   :  { %1015 = vmatprep.subr.bf16.mxu0 %v1114_v35 }
  0x71   :  { %1034 = vmatpush3.bf16.msra.mxu1 %v1121_v42 }
  0x72   :  { %1035 = vmatprep.subr.bf16.mxu1 %v1122_v10 }
  0x73   :  { %1016 = vmatpush3.bf16.msra.mxu0 %v1114_v35  ;;  %v1132_v35 = vld [vmem:[#allocation10] sm:$0xff]  }
  0x74   :  { %1017 = vmatprep.subr.bf16.mxu0 %v1115_v36 }
  0x75   :  { %1036 = vmatpush3.bf16.msra.mxu1 %v1122_v10 }
  0x76   :  { %1037 = vmatprep.subr.bf16.mxu1 %v1123_v11 }
  0x77   :  { %1018 = vmatpush3.bf16.msra.mxu0 %v1115_v36 }
  0x78   :  { %1019 = vmatprep.subr.bf16.mxu0 %v1116_v37 }
  0x79   :  { %1038 = vmatpush3.bf16.msra.mxu1 %v1123_v11 }
  0x7a   :  { %1039 = vmatprep.subr.bf16.mxu1 %v1124_v12 }
  0x7b   :  { %1020 = vmatpush3.bf16.msra.mxu0 %v1116_v37 }
  0x7c   :  { %1045 = vmatprep.subr.bf16.mxu0 %v1125_v13 }
  0x7d   :  { %1040 = vmatpush3.bf16.msra.mxu1 %v1124_v12 }
 0x11e   :  { %v933_v43 = vpop.f32.mrf.mxu0 }
 0x120   :  { %v934_v44 = vpop.f32.mrf.mxu0  ;;  %v1003_v47 = vpop.f32.mrf.mxu1 }
 0x121   :  { %v935_v46 = vadd.f32 %v934_v44, %v933_v43 }
 0x122   :  { %v936_v48 = vpop.f32.mrf.mxu0  ;;  %v424_v50 = vpop.f32.mrf.mxu1 }
 0x123   :  { %v376_v49 = vadd.f32 %v935_v46, %v859_v45 }
 0x124   :  { %v937_v51 = vpop.f32.mrf.mxu0  ;;  %v1004_v53 = vpop.f32.mrf.mxu1 }
 0x125   :  { %v938_v52 = vadd.f32 %v937_v51, %v936_v48  ;;  %v425_v55 = vadd.f32 %v424_v50, %v376_v49  ;;  %v908_v51 = vld [vmem:[%s1385_s8] ss:$0 sm:$0xff]  ;;  %s845_s8 = sshll.u32 %s1278_s6, 4  ;;  %s846_s8 = int_to_ptr.vmem [resolvable:$true] %s845_s8 }
 0x126   :  { %v939_v54 = vpop.f32.mrf.mxu0  ;;  %v427_v57 = vpop.f32.mrf.mxu1  ;;  %s1241_s18 = scalar_lea.vmem %s846_s8, 512  ;;  %p1246_p12 = scmp.lt.s32.totalorder %s846_s8, %s846_s8 }
 0x127   :  { %v379_v56 = vadd.f32 %v938_v52, %v859_v45  ;;  %v439_v62 = vmax.f32 %v425_v55, 0.0  ;;  %p1242_p11 = scmp.ne.s32.totalorder %s846_s8, %s1241_s18  ;;  %p1247_p13 = scmp.lt.s32.totalorder %s1241_s18, %s1241_s18 }
 0x128   :  { %v940_v58 = vpop.f32.mrf.mxu0 }
 0x129   :  { %v941_v59 = vadd.f32 %v940_v58, %v939_v54  ;;  %v428_v60 = vadd.f32 %v427_v57, %v379_v56  ;;  %p1248_p0 = por %p1247_p13, %p1246_p12 }
 0x12a   :  { %v942_v61 = vpop.f32.mrf.mxu0 }
 0x12b   :  { %v384_v63 = vadd.f32 %v941_v59, %v859_v45  ;;  %v440_v0 = vmax.f32 %v428_v60, 0.0  ;;  %v817_v60 = vlaneseq  ;;  %p1249_p1 = pnand %p1248_p0, %p1242_p11 }
 0x12c   :  { %v943_v1 = vpop.f32.mrf.mxu0 }
 0x12d   :  { %v443_v2 = vpack.c.bf16 %v440_v0, %v439_v62  ;;  %v944_v3 = vadd.f32 %v943_v1, %v942_v61  ;;  %v433_v4 = vadd.f32 %v1003_v47, %v384_v63  ;;  %v818_v61 = vand.u32 127, %v817_v60 }
 0x12f   :  { %v387_v5 = vadd.f32 %v944_v3, %v859_v45  ;;  %1021 = vmatprep.mubr.bf16.mxu0 %v443_v2  ;;  %v441_v7 = vmax.f32 %v433_v4, 0.0  ;;  %vm819_vm0 = vcmp.eq.s32.totalorder %v818_v61, 0 }
 0x131   :  { %v436_v6 = vadd.f32 %v1004_v53, %v387_v5 }
 0x133   :  { %v442_v8 = vmax.f32 %v436_v6, 0.0 }
 0x135   :  { %v444_v9 = vpack.c.bf16 %v442_v8, %v441_v7 }
 0x137   :  { %1022 = vmatmul.mubr.bf16.vlgmr.msra.gmra.mxu0 %v444_v9 }
 0x138   :  { %1046 = vmatpush3.bf16.msra.mxu0 %v1125_v13 }
 0x139   :  { %1047 = vmatprep.subr.bf16.mxu0 %v1126_v14 }
 0x13c   :  { %1048 = vmatpush3.bf16.msra.mxu0 %v1126_v14 }
 0x13d   :  { %1049 = vmatprep.subr.bf16.mxu0 %v1127_v15 }
 0x140   :  { %1050 = vmatpush3.bf16.msra.mxu0 %v1127_v15 }
 0x141   :  { %1051 = vmatprep.subr.bf16.mxu0 %v1128_v16 }
 0x144   :  { %1052 = vmatpush3.bf16.msra.mxu0 %v1128_v16 }
 0x145   :  { %1053 = vmatprep.subr.bf16.mxu0 %v1129_v17 }
 0x148   :  { %1054 = vmatpush3.bf16.msra.mxu0 %v1129_v17 }
 0x149   :  { %1055 = vmatprep.subr.bf16.mxu0 %v1130_v33 }
 0x14c   :  { %1056 = vmatpush3.bf16.msra.mxu0 %v1130_v33 }
 0x14d   :  { %1057 = vmatprep.subr.bf16.mxu0 %v1131_v34 }
 0x150   :  { %1058 = vmatpush3.bf16.msra.mxu0 %v1131_v34 }
 0x151   :  { %1059 = vmatprep.subr.bf16.mxu0 %v1132_v35 }
 0x154   :  { %1060 = vmatpush3.bf16.msra.mxu0 %v1132_v35 }
 0x1f7   :  { %v1023_v18 = vpop.f32.mrf.mxu0 }
 0x1f8   :  { %v559_v24 = vadd.f32 %v1023_v18, %v890_v20 }
 0x1f9   :  { %v550_v19 = vpop.f32.mrf.mxu0 }
 0x1fa   :  { %v551_v22 = vadd.f32 %v890_v20, %v550_v19  ;;  %v567_v30 = vmax.f32 %v559_v24, 0.0 }
 0x1fb   :  { %v1024_v21 = vpop.f32.mrf.mxu0 }
 0x1fc   :  { %v562_v23 = vadd.f32 %v1024_v21, %v890_v20  ;;  %v565_v28 = vmax.f32 %v551_v22, 0.0 }
 0x1fd   :  { %v553_v25 = vpop.f32.mrf.mxu0 }
 0x1fe   :  { %v554_v26 = vadd.f32 %v890_v20, %v553_v25  ;;  %v568_v27 = vmax.f32 %v562_v23, 0.0 }
 0x200   :  { %v566_v29 = vmax.f32 %v554_v26, 0.0  ;;  %v570_v32 = vpack.c.bf16 %v568_v27, %v567_v30 }
 0x202   :  { %v569_v31 = vpack.c.bf16 %v566_v29, %v565_v28 }
 0x204   :  { %1041 = vmatprep.mubr.bf16.mxu1 %v569_v31 }
 0x205   :  { %1042 = vmatmul.mubr.bf16.vlgmr.msra.gmra.mxu1 %v570_v32 }
 0x2c5   :  { %v1043_v36 = vpop.f32.mrf.mxu1 }
 0x2c6   :  { %v685_v42 = vadd.f32 %v1043_v36, %v899_v38 }
 0x2c7   :  { %v676_v37 = vpop.f32.mrf.mxu1 }
 0x2c8   :  { %v677_v40 = vadd.f32 %v899_v38, %v676_v37  ;;  %v693_v48 = vmax.f32 %v685_v42, 0.0 }
 0x2c9   :  { %v1044_v39 = vpop.f32.mrf.mxu1 }
 0x2ca   :  { %v688_v41 = vadd.f32 %v1044_v39, %v899_v38  ;;  %v691_v46 = vmax.f32 %v677_v40, 0.0 }
 0x2cb   :  { %v679_v43 = vpop.f32.mrf.mxu1 }
 0x2cc   :  { %v680_v44 = vadd.f32 %v899_v38, %v679_v43  ;;  %v694_v45 = vmax.f32 %v688_v41, 0.0 }
 0x2ce   :  { %v692_v47 = vmax.f32 %v680_v44, 0.0  ;;  %v696_v50 = vpack.c.bf16 %v694_v45, %v693_v48 }
 0x2d0   :  { %v695_v49 = vpack.c.bf16 %v692_v47, %v691_v46 }
 0x2d2   :  { %1061 = vmatprep.mubr.bf16.mxu0 %v695_v49 }
 0x2d3   :  { %1062 = vmatmul.mubr.bf16.vlgmr.msra.gmra.mxu0 %v696_v50 }
 0x393   :  { %v1063_v52 = vpop.f32.mrf.mxu0 }
 0x394   :  { %v811_v53 = vadd.f32 %v1063_v52, %v908_v51 }
 0x395   :  { %v802_v54 = vpop.f32.mrf.mxu0 }
 0x396   :  { %1133 = vtanh.f32 %v811_v53  ;;  %v803_v55 = vadd.f32 %v908_v51, %v802_v54  ;;  %v822_v63 = vmax.f32 %v811_v53, 0.0 }
 0x397   :  { %v1064_v56 = vpop.f32.mrf.mxu0 }
 0x398   :  { %1135 = vtanh.f32 %v803_v55  ;;  %v814_v57 = vadd.f32 %v1064_v56, %v908_v51  ;;  %v820_v3 = vmax.f32 %v803_v55, 0.0 }
 0x399   :  { %v805_v58 = vpop.f32.mrf.mxu0 }
 0x39a   :  { %1137 = vtanh.f32 %v814_v57  ;;  %v806_v59 = vadd.f32 %v908_v51, %v805_v58  ;;  %v823_v7 = vmax.f32 %v814_v57, 0.0 }
 0x39c   :  { %1139 = vtanh.f32 %v806_v59  ;;  %v821_v11 = vmax.f32 %v806_v59, 0.0 }
 0x3a3   :  { %v1134_v62 = vpop.eup %1133 }
 0x3a4   :  { %v830_v0 = vmul.f32 3.0, %v1134_v62 }
 0x3a5   :  { %v1136_v1 = vpop.eup %1135 }
 0x3a6   :  { %v834_v2 = vsel %vm819_vm0, %v822_v63, %v830_v0  ;;  %v828_v4 = vmul.f32 3.0, %v1136_v1 }
 0x3a7   :  { %v1138_v5 = vpop.eup %1137  ;;  %838 = vst [vmem:[#allocation11 + $0x10] sm:$0xff] %v834_v2 }
 0x3a8   :  { %v832_v6 = vsel %vm819_vm0, %v820_v3, %v828_v4  ;;  %v831_v8 = vmul.f32 3.0, %v1138_v5 }
 0x3a9   :  { %v1140_v9 = vpop.eup %1139  ;;  %836 = vst [vmem:[#allocation11] sm:$0xff] %v832_v6 }
 0x3aa   :  { %v835_v10 = vsel %vm819_vm0, %v823_v7, %v831_v8  ;;  %v829_v12 = vmul.f32 3.0, %v1140_v9 }
 0x3ab   :  { %839 = vst [vmem:[#allocation11 + $0x18] sm:$0xff] %v835_v10 }
 0x3ac   :  { %v833_v13 = vsel %vm819_vm0, %v821_v11, %v829_v12 }
 0x3ad   :  { %837 = vst [vmem:[#allocation11 + $0x8] sm:$0xff] %v833_v13 }
 0x3ae   :  { %1252 = shalt.err (!%p1249_p1)
}
 0x3af   :  { %s1279_s19 = smov 128   ;;  %s1280_s20 = smov 8  }
 0x3b0   :  { %851 = dma.vmem_to_hbm [thread:$0]  %s846_s8, 512, %s1386_s9, [#allocation4], %s1279_s19, %s1279_s19, %s1280_s20  }
 0x3b1   :  { %1267 = dma.done.wait [#allocation4], 512  }
 0x3b2   :  { %1268 = vsyncadd [#allocation4], 4294966784 }
 0x3b3   :  { %855 = vsyncpa [#allocation3], 1 }
 0x3b4   :  { %856 = vsyncpa [#allocation6], 1 }
 0x3b5   :  { %857 = vsyncpa [#allocation9], 1 }
 0x3b6   :  { %858 = vsyncpa [#allocation4], 1 }

</bundles_post_ra>
